<compile_context>
chip_gen: v5e
topology: v5e:2x2
jax: 0.10.0
libtpu: 0.0.40
codegen_flags: <defaults>
</compile_context>

<pallas_src>
import numpy as np
import jax
import jax.numpy as jnp
from jax import lax
from jax.experimental import pallas as pl
from jax.experimental.pallas import tpu as pltpu


# ----------------------------------------------------------------------------- kernel
def _agg_clustered_sum_kernel(c_ref, bw_ref, hs_ref, w_ref, bias_ref, g_ref):
    """One grid step == `bb` batch elements.

    c_ref    : (bc, Mp, N)     bf16/f32  host-folded selection/aggregation matrices
                               (bc == bb for per-batch cs, bc == 1 for shared cs)
    bw_ref   : (bc, Mp, 1)     f32       per-output-row bias weights
    hs_ref   : (bb, N, h_dim)  f32       encoded points
    w_ref    : (h_dim, g_pad)  f32       FC weight, zero-padded to lane-dense width
    bias_ref : (1, g_pad)      f32       FC bias, zero-padded
    g_ref    : (bb, Mp, g_pad) f32       output G (padded)
    """
    bb, n_pts, h_dim = hs_ref.shape
    mp = c_ref.shape[1]
    g_pad = w_ref.shape[1]

    c = c_ref[...].astype(jnp.float32)
    bw = bw_ref[...]
    if c.shape[0] != bb:
        # Shared single-cs pattern: block is VMEM-resident, broadcast in-register.
        c = jnp.broadcast_to(c, (bb, mp, n_pts))
        bw = jnp.broadcast_to(bw, (bb, mp, 1))

    # MXU matmul 1: per-batch cluster aggregation (bb,Mp,N) x (bb,N,h) -> (bb,Mp,h).
    tmp = lax.dot_general(
        c, hs_ref[...],
        dimension_numbers=(((2,), (1,)), ((0,), (0,))),
        preferred_element_type=jnp.float32)

    # MXU matmul 2: shared FC weight.  Mp is a multiple of 8, so collapsing
    # (bb, Mp) into the sublane dim is tile-aligned (no relayout copy).
    flat = jnp.dot(tmp.reshape(bb * mp, h_dim), w_ref[...],
                   preferred_element_type=jnp.float32)

    bias_full = jnp.broadcast_to(bias_ref[...].reshape(1, 1, g_pad),
                                 (bb, mp, g_pad))
    bw_full = jnp.broadcast_to(bw, (bb, mp, g_pad))
    g_ref[...] = flat.reshape(bb, mp, g_pad) + bw_full * bias_full


# ----------------------------------------------------------------------------- host-side folding
def _round_up(x, m):
    return ((x + m - 1) // m) * m


def _build_host_operands(cs, n, K, Mp):
    """Vectorized folding of every cs-derived quantity (no Python loops over B/K).

    Returns:
      C      (Bc, Mp, N)   f32   G_b[:K+1] = C_b[:K+1] @ hs_b @ W + bw * bias
      bw     (Bc, Mp, 1)   f32   per-output-row bias weight
      G_mask (Bc, K+1)     f32
    """
    Bc, N = cs.shape
    many = Bc > 1
    M = 2 * K + 1
    Kp1 = K + 1
    ks = np.arange(K)

    # One-hot cluster membership (cs[:, n:] already == -1, so column n is 0).
    onehot = (cs[:, None, :] == ks[None, :, None]).astype(np.float32)     # (Bc,K,N)

    # Selection matrix A (Bc, 2K+1, N): H = A @ hs reproduces the torch H rows.
    A = np.zeros((Bc, M, N), np.float32)
    A[:, :K] = onehot
    A[:, K:2 * K] = onehot
    A[:, K:, n] += 1.0                                  # rows K..2K also add hs[n]

    # Static (K+1, 2K+1) aggregation matrix encoding the torch `inds` selections.
    inds = np.zeros((Kp1, M), np.float32)
    if K > 0:
        inds[:K, :K] = 1.0 - np.eye(K, dtype=np.float32)
        inds[ks, ks + K] = 1.0
    inds[K, :K] = 1.0
    inds[K, M - 1] = 1.0

    if many:
        pres = onehot.any(axis=2).astype(np.float32)                      # (Bc,K)
        presG = np.concatenate([pres, np.ones((Bc, 1), np.float32)], 1)   # (Bc,K+1)
        gs_mask = np.concatenate([pres, pres, np.ones((Bc, 1), np.float32)], 1)
    else:
        presG = np.ones((Bc, Kp1), np.float32)
        gs_mask = np.ones((Bc, M), np.float32)

    # Combined (Bc, K+1, 2K+1) aggregation incl. gs_mask and output presence mask.
    comb = presG[:, :, None] * inds[None] * gs_mask[:, None, :]

    # Relocation of the "new cluster" row (many-cs branch only) + G_mask.
    G_mask = np.ones((Bc, Kp1), np.float32)
    if many:
        Ks = cs.max(axis=1)
        reloc = (Ks >= 0) & (Ks <= K - 2)
        rows = np.nonzero(reloc)[0]
        if rows.size:
            comb[rows, Ks[rows] + 1] = comb[rows, K]
            comb[rows, K] = 0.0
            cols = np.arange(Kp1)[None, :]
            G_mask[rows] = np.where(cols >= (Ks[rows] + 2)[:, None], 0.0, 1.0)

    Cb = np.einsum('bkm,bmn->bkn', comb, A)             # (Bc, K+1, N)
    bwb = comb.sum(axis=2)                              # (Bc, K+1)

    C = np.zeros((Bc, Mp, N), np.float32)
    C[:, :Kp1] = Cb
    bw = np.zeros((Bc, Mp, 1), np.float32)
    bw[:, :Kp1, 0] = bwb
    return C, bw, G_mask


# ----------------------------------------------------------------------------- block sizing
def _choose_batch_block(B, N, h_dim, Mp, g_pad, many, c_itemsize, vmem_budget):
    """Largest divisor of B whose double-buffered footprint fits the VMEM budget;
    prefer >= 2 grid steps (v7x megacore) when each step still moves >= 1 MiB."""
    n_sub = _round_up(max(N, 1), 8)
    n_lane = _round_up(max(N, 1), 128)
    h_lane = _round_up(h_dim, 128)
    h_sub = _round_up(h_dim, 8)

    def hs_bytes(bb):
        return bb * n_sub * h_lane * 4

    def footprint(bb):
        bc = bb if many else 1
        c_b = bc * max(Mp, 16) * n_lane * c_itemsize
        bw_b = bc * Mp * 128 * 4
        out_b = bb * Mp * g_pad * 4
        w_b = h_sub * g_pad * 4
        bias_b = 8 * g_pad * 4
        return 2 * (hs_bytes(bb) + out_b + c_b + bw_b + w_b + bias_b)

    divisors = [d for d in range(B, 0, -1) if B % d == 0]
    fitting = [d for d in divisors if footprint(d) <= vmem_budget] or [1]
    bb = fitting[0]
    for d in fitting:
        if B // d >= 2 and hs_bytes(d) >= (1 << 20):
            bb = d
            break
    return bb


# ----------------------------------------------------------------------------- glue
def aggregate_clustered_sum(hs, cs_o, n, W, bias, *, batch_block=None):
    """Pallas implementation of AggregateClusteredSum.forward(hs, cs_o, n)."""
    hs = jnp.asarray(hs, jnp.float32)
    B, N, h_dim = hs.shape
    g_dim = int(W.shape[1])

    cs_np = np.asarray(cs_o).copy()
    assert cs_np.ndim == 2
    assert cs_np.shape[0] in (1, B), "cs must have 1 or B rows"
    assert cs_np.shape[1] == N
    cs_np[:, n:] = -1
    K = int(cs_np.max()) + 1          # data-dependent -> computed on host (cs concrete)
    many = cs_np.shape[0] > 1

    Kp1 = K + 1
    Mp = _round_up(Kp1, 8)            # sublane-dense output rows (buckets K mod 8)
    g_pad = _round_up(g_dim, 128)     # lane-dense output columns

    C_np, bw_np, Gmask_np = _build_host_operands(cs_np, int(n), K, Mp)

    # C holds small integer counts (<= K+1); bf16 is lossless up to 256.
    c_dtype = jnp.bfloat16 if Kp1 <= 256 else jnp.float32
    c_itemsize = 2 if c_dtype == jnp.bfloat16 else 4

    # VMEM budget / batch block size (no jnp.pad of hs: bb divides B).
    try:
        vmem_cap = int(pltpu.get_tpu_info().vmem_capacity_bytes)
    except Exception:
        vmem_cap = 64 << 20           # conservative (v7x physical VMEM per TC)
    vmem_limit = int(min(vmem_cap, 128 << 20) * 3 // 4)
    vmem_budget = int(vmem_limit * 0.85)

    if batch_block is not None:
        bb = max(1, min(int(batch_block), B))
        while B % bb != 0:
            bb -= 1
    else:
        bb = _choose_batch_block(B, N, h_dim, Mp, g_pad, many,
                                 c_itemsize, vmem_budget)
    num_blocks = B // bb
    bc = bb if many else 1

    W_pad = np.zeros((h_dim, g_pad), np.float32)
    W_pad[:, :g_dim] = np.asarray(W, np.float32)
    bias_pad = np.zeros((1, g_pad), np.float32)
    bias_pad[0, :g_dim] = np.asarray(bias, np.float32).reshape(g_dim)

    C = jnp.asarray(C_np, dtype=c_dtype)
    bw = jnp.asarray(bw_np)
    Wp = jnp.asarray(W_pad)
    bias_row = jnp.asarray(bias_pad)

    c_index = (lambda i: (i, 0, 0)) if many else (lambda i: (0, 0, 0))

    G_pad = pl.pallas_call(
        _agg_clustered_sum_kernel,
        grid=(num_blocks,),
        in_specs=[
            pl.BlockSpec((bc, Mp, N), c_index),                 # C (VMEM-resident if shared)
            pl.BlockSpec((bc, Mp, 1), c_index),                 # bias weights
            pl.BlockSpec((bb, N, h_dim), lambda i: (i, 0, 0)),  # hs
            pl.BlockSpec((h_dim, g_pad), lambda i: (0, 0)),     # W (shared)
            pl.BlockSpec((1, g_pad), lambda i: (0, 0)),         # bias row (shared)
        ],
        out_specs=pl.BlockSpec((bb, Mp, g_pad), lambda i: (i, 0, 0)),
        out_shape=jax.ShapeDtypeStruct((B, Mp, g_pad), jnp.float32),
        compiler_params=pltpu.CompilerParams(
            dimension_semantics=("parallel",),
            vmem_limit_bytes=vmem_limit),
    )(C, bw, hs, Wp, bias_row)

    # Slice only the padding that was actually added (no batch padding exists).
    if (Mp != Kp1) or (g_pad != g_dim):
        G = G_pad[:, :Kp1, :g_dim]
    else:
        G = G_pad

    if many:
        G_mask = jnp.asarray(Gmask_np)
    else:
        G_mask = jnp.ones((B, Kp1), jnp.float32)
    return G, G_mask


# ----------------------------------------------------------------------------- numpy reference (mirrors the torch code)
def _reference_forward(hs, cs_o, n, W, bvec):
    hs = np.asarray(hs, np.float32)
    cs = np.asarray(cs_o).copy()
    cs[:, n:] = -1
    K = int(cs.max()) + 1
    B, _, h_dim = hs.shape
    g_dim = W.shape[1]
    many = cs.shape[0] > 1
    if many:
        Ks = cs.max(axis=1)
    H = np.zeros((B, 2 * K + 1, h_dim), np.float32)
    G = np.zeros((B, K + 1, g_dim), np.float32)
    if many:
        gs_mask = np.zeros((B, 2 * K + 1, 1), np.float32)
    for k in range(K):
        mask = (cs == k).astype(np.float32)[:, :, None]
        H[:, k, :] = (hs * mask).sum(1)
        H[:, k + K, :] = H[:, k, :] + hs[:, n, :]
        if many:
            gs_mask[:, k] = np.any(cs == k, axis=1, keepdims=True) * 1.0
            gs_mask[:, k + K] = gs_mask[:, k]
    H[:, 2 * K, :] = hs[:, n, :]
    if many:
        gs_mask[:, 2 * K] = 1.0
    gs = (H.reshape(B * (2 * K + 1), h_dim) @ W + bvec).reshape(B, 2 * K + 1, g_dim)
    if many:
        gs = gs_mask * gs
    for k in range(K):
        inds = np.array([True] * K + [False] * (K + 1))
        inds[k] = False
        inds[k + K] = True
        G[:, k, :] = gs[:, inds, :].sum(1)
    inds = np.array([True] * K + [False] * K + [True])
    G[:, K, :] = gs[:, inds, :].sum(1)
    if many:
        G[:, :K] = G[:, :K] * gs_mask[:, :K]
    G_mask = np.ones((B, K + 1), np.float32)
    if many:
        for k in range(K - 1):
            which = Ks == k
            G[which, k + 1, :] = G[which, -1, :]
            G[which, -1, :] = 0
            G_mask[which, k + 2:] = 0
    return G, G_mask


# ----------------------------------------------------------------------------- main
if __name__ == "__main__":
    # TODO(synk): bckbn.FC internals are not available; it is modeled here as a
    # single deterministic Linear(h_dim -> g_dim) with bias.
    B, N, h_dim, g_dim = 2, 16, 32, 16
    n = 10

    key = jax.random.PRNGKey(0)
    k1, k2, k3 = jax.random.split(key, 3)
    hs = jax.random.normal(k1, (B, N, h_dim), jnp.float32)
    W = jax.random.normal(k2, (h_dim, g_dim), jnp.float32) * 0.1
    bias = jax.random.normal(k3, (g_dim,), jnp.float32) * 0.1

    # Deterministic cluster assignments: row 0 uses clusters {0,1,2}, row 1 only
    # {0,1} within the first n points (exercises presence masks + Ks relocation).
    cs_many = np.array(
        [[0, 0, 1, 1, 2, 2, 2, 0, 1, 2, 0, 1, 2, 0, 1, 2],
         [0, 0, 0, 1, 1, 1, 0, 1, 0, 1, 2, 2, 0, 1, 2, 0]], dtype=np.int32)
    cs_single = cs_many[:1]  # ground-truth-label branch ([1, N])

    for cs_o in (cs_many, cs_single):
        G, G_mask = aggregate_clustered_sum(hs, cs_o, n, W, bias)
        G = jax.block_until_ready(G)
        G_mask = jax.block_until_ready(G_mask)
        G_ref, G_mask_ref = _reference_forward(np.asarray(hs), cs_o, n,
                                               np.asarray(W), np.asarray(bias))
        np.testing.assert_allclose(np.asarray(G, dtype=np.float32), G_ref,
                                   rtol=1e-4, atol=1e-4)
        np.testing.assert_allclose(np.asarray(G_mask), G_mask_ref, rtol=0, atol=0)

    print("KERNEL_OK")
</pallas_src>

<mosaic_0001>
module attributes {stable_mosaic.version = 11 : i64} {
  func.func @_agg_clustered_sum_kernel(%arg0: i32, %arg1: memref<2x8x16xbf16, #tpu.memory_space<vmem>>, %arg2: memref<2x8x1xf32, #tpu.memory_space<vmem>>, %arg3: memref<2x16x32xf32, #tpu.memory_space<vmem>>, %arg4: memref<32x128xf32, #tpu.memory_space<vmem>>, %arg5: memref<1x128xf32, #tpu.memory_space<vmem>>, %arg6: memref<2x8x128xf32, #tpu.memory_space<vmem>>) attributes {dimension_semantics = [#tpu.dimension_semantics<parallel>], iteration_bounds = array<i64: 1>, scalar_prefetch = 0 : i64, scratch_operands = 0 : i64, tpu.core_type = #tpu.core_type<tc>, window_params = [{transform_indices = @transform_0, window_bounds = array<i64: 2, 8, 16>}, {transform_indices = @transform_1, window_bounds = array<i64: 2, 8, 1>}, {transform_indices = @transform_2, window_bounds = array<i64: 2, 16, 32>}, {pipeline_mode = #tpu.pipeline_mode<synchronous>, transform_indices = @transform_3, window_bounds = array<i64: 32, 128>}, {pipeline_mode = #tpu.pipeline_mode<synchronous>, transform_indices = @transform_4, window_bounds = array<i64: 1, 128>}, {transform_indices = @transform_5, window_bounds = array<i64: 2, 8, 128>}]} {
    %c0 = arith.constant 0 : index
    %c0_0 = arith.constant 0 : index
    %c0_1 = arith.constant 0 : index
    %0 = vector.load %arg1[%c0, %c0_0, %c0_1] : memref<2x8x16xbf16, #tpu.memory_space<vmem>>, vector<2x8x16xbf16>
    %1 = arith.extf %0 : vector<2x8x16xbf16> to vector<2x8x16xf32>
    %c0_2 = arith.constant 0 : index
    %c0_3 = arith.constant 0 : index
    %c0_4 = arith.constant 0 : index
    %2 = vector.load %arg2[%c0_2, %c0_3, %c0_4] : memref<2x8x1xf32, #tpu.memory_space<vmem>>, vector<2x8x1xf32>
    %c0_5 = arith.constant 0 : index
    %c0_6 = arith.constant 0 : index
    %c0_7 = arith.constant 0 : index
    %3 = vector.load %arg3[%c0_5, %c0_6, %c0_7] : memref<2x16x32xf32, #tpu.memory_space<vmem>>, vector<2x16x32xf32>
    %cst = arith.constant dense<0.000000e+00> : vector<2x8x32xf32>
    %4 = tpu.matmul %1, %3, %cst {dimension_numbers = #tpu.dot_dimension_numbers<[2], [1], [1], [2], [0, 0, 0, 1, 1, 2], [0], [0]>} : vector<2x8x16xf32>, vector<2x16x32xf32>, vector<2x8x32xf32> -> vector<2x8x32xf32>
    %5 = vector.shape_cast %4 : vector<2x8x32xf32> to vector<16x32xf32>
    %c0_8 = arith.constant 0 : index
    %c0_9 = arith.constant 0 : index
    %6 = vector.load %arg4[%c0_8, %c0_9] : memref<32x128xf32, #tpu.memory_space<vmem>>, vector<32x128xf32>
    %cst_10 = arith.constant dense<0.000000e+00> : vector<16x128xf32>
    %7 = tpu.matmul %5, %6, %cst_10 {dimension_numbers = #tpu.dot_dimension_numbers<[1], [0], [0], [1], [0, 0, 1, 1], [], []>} : vector<16x32xf32>, vector<32x128xf32>, vector<16x128xf32> -> vector<16x128xf32>
    %c0_11 = arith.constant 0 : index
    %c0_12 = arith.constant 0 : index
    %8 = vector.load %arg5[%c0_11, %c0_12] : memref<1x128xf32, #tpu.memory_space<vmem>>, vector<1x128xf32>
    %9 = vector.shape_cast %8 : vector<1x128xf32> to vector<1x1x128xf32>
    %10 = vector.shape_cast %9 : vector<1x1x128xf32> to vector<1x1x128xf32>
    %11 = vector.broadcast %10 : vector<1x1x128xf32> to vector<2x8x128xf32>
    %12 = vector.shape_cast %2 : vector<2x8x1xf32> to vector<2x8x1xf32>
    %13 = vector.broadcast %12 : vector<2x8x1xf32> to vector<2x8x128xf32>
    %14 = vector.shape_cast %7 : vector<16x128xf32> to vector<2x8x128xf32>
    %15 = arith.mulf %13, %11 : vector<2x8x128xf32>
    %16 = arith.addf %14, %15 : vector<2x8x128xf32>
    %c0_13 = arith.constant 0 : index
    %c0_14 = arith.constant 0 : index
    %c0_15 = arith.constant 0 : index
    %17 = vector.load %arg6[%c0_13, %c0_14, %c0_15] : memref<2x8x128xf32, #tpu.memory_space<vmem>>, vector<2x8x128xf32>
    tpu.vector_store %arg6[%c0_13, %c0_14, %c0_15], %16 {strides = array<i32>} : memref<2x8x128xf32, #tpu.memory_space<vmem>>, vector<2x8x128xf32>,
    return
  }
  func.func @transform_0(%arg0: i32) -> (i32, i32, i32) {
    %c0_i32 = arith.constant 0 : i32
    %c0_i32_0 = arith.constant 0 : i32
    %c0_i32_1 = arith.constant 0 : i32
    return %arg0, %c0_i32, %c0_i32_0 : i32, i32, i32
  }
  func.func @transform_1(%arg0: i32) -> (i32, i32, i32) {
    %c0_i32 = arith.constant 0 : i32
    %c0_i32_0 = arith.constant 0 : i32
    %c0_i32_1 = arith.constant 0 : i32
    return %arg0, %c0_i32, %c0_i32_0 : i32, i32, i32
  }
  func.func @transform_2(%arg0: i32) -> (i32, i32, i32) {
    %c0_i32 = arith.constant 0 : i32
    %c0_i32_0 = arith.constant 0 : i32
    %c0_i32_1 = arith.constant 0 : i32
    return %arg0, %c0_i32, %c0_i32_0 : i32, i32, i32
  }
  func.func @transform_3(%arg0: i32) -> (i32, i32) {
    %c0_i32 = arith.constant 0 : i32
    %c0_i32_0 = arith.constant 0 : i32
    %c0_i32_1 = arith.constant 0 : i32
    return %c0_i32, %c0_i32_0 : i32, i32
  }
  func.func @transform_4(%arg0: i32) -> (i32, i32) {
    %c0_i32 = arith.constant 0 : i32
    %c0_i32_0 = arith.constant 0 : i32
    %c0_i32_1 = arith.constant 0 : i32
    return %c0_i32, %c0_i32_0 : i32, i32
  }
  func.func @transform_5(%arg0: i32) -> (i32, i32, i32) {
    %c0_i32 = arith.constant 0 : i32
    %c0_i32_0 = arith.constant 0 : i32
    %c0_i32_1 = arith.constant 0 : i32
    return %arg0, %c0_i32, %c0_i32_0 : i32, i32, i32
  }
}

</mosaic_0001>

<bundles_post_ra>
// kernel: tpu_custom_call.1
= control target key start
LH: loop header
LB: loop body
LE: loop exit
PB: predicated region body
PF: predicated region fallthrough
CT: control target
= control target key end

     0   :  { %10 = vsyncpa [#allocation3], 0  ;;  %s348_s0 = inlined_call_operand.vmem [shape: bf16[2,8,16], index: 0, kind: input, shape index: {}]   ;;  %s349_s1 = inlined_call_operand.vmem [shape: f32[2,8,1], index: 1, kind: input, shape index: {}]   ;;  %s350_s2 = inlined_call_operand.hbm [shape: f32[2,16,32], index: 2, kind: input, shape index: {}]   ;;  %s351_s3 = inlined_call_operand.hbm [shape: f32[32,128], index: 3, kind: input, shape index: {}]   ;;  %s352_s4 = inlined_call_operand.vmem [shape: f32[1,128], index: 4, kind: input, shape index: {}]   ;;  %s353_s5 = inlined_call_operand.hbm [shape: f32[2,8,128], index: 5, kind: output, shape index: {}]  }
   0x1   :  { %11 = vsyncpa [#allocation6], 0 }
   0x2   :  { %12 = vsyncpa [#allocation4], 0  ;;  %s21_s20 = sshll.u32 %s350_s2, 4  ;;  %s282_s21 = smov [#allocation2]   ;;  %s22_s20 = int_to_ptr.hbm [resolvable:$true] %s21_s20 }
   0x3   :  { %s23_s22 = sshll.u32 %s282_s21, 4  ;;  %s34_s25 = sshll.u32 %s351_s3, 4  ;;  %s24_s22 = int_to_ptr.vmem [resolvable:$true] %s23_s22  ;;  %s35_s25 = int_to_ptr.hbm [resolvable:$true] %s34_s25 }
   0x4   :  { %s283_s26 = smov 128   ;;  %s284_s27 = smov 8  }
   0x5   :  { %29 = dma.hbm_to_vmem [thread:$0]  %s22_s20, 512, %s24_s22, [#allocation3], %s283_s26, %s283_s26, %s284_s27  }
   0x6   :  { %s285_s28 = smov [#allocation5]  }
   0x7   :  { %s36_s29 = sshll.u32 %s285_s28, 4  ;;  %s37_s29 = int_to_ptr.vmem [resolvable:$true] %s36_s29 }
   0x8   :  { %42 = dma.hbm_to_vmem [thread:$0]  %s35_s25, 512, %s37_s29, [#allocation6], %s283_s26, %s283_s26, %s284_s27  }
   0x9   :  { %276 = dma.done.wait [#allocation3], 512  }
   0xa   :  { %277 = vsyncadd [#allocation3], 4294966784 }
   0xb   :  { %278 = dma.done.wait [#allocation6], 512  }
   0xc   :  { %279 = vsyncadd [#allocation6], 4294966784  ;;  %v286_v0 = vmov 0   ;;  %v60_v1 = vld [vmem:[#allocation2 + $0x8] sm:$0xff]  ;;  %v62_v2 = vld [vmem:[#allocation2 + $0x18] sm:$0xff]  ;;  %vm63_vm0 = vcmask 130048  }
   0xd   :  { %202 = vset.pattern.permute.xlu0 %v286_v0  ;;  %v59_v3 = vld [vmem:[#allocation2] sm:$0xff]  ;;  %81 = vmatpush.msra.mxu0 %v60_v1  ;;  %v61_v4 = vld [vmem:[#allocation2 + $0x10] sm:$0xff]  ;;  %v113_v6 = vld [vmem:[#allocation5 + $0x18] sm:$0xff]  ;;  %vm114_vm1 = vcmask 261120   ;;  %s287_s10 = smov [#allocation7]  }
   0xe   :  { %104 = vmatpush.msra.mxu1 %v62_v2  ;;  %v189_v5 = vld [vmem:[%s348_s0] sm:$0xff]   ;;  %133 = vmatpush.msra.mxu2 %v113_v6  ;;  %v112_v9 = vld [vmem:[#allocation5 + $0x10] sm:$0xff]  ;;  %v111_v11 = vld [vmem:[#allocation5 + $0x8] sm:$0xff]  ;;  %s168_s11 = sshll.u32 %s287_s10, 4  ;;  %s169_s11 = int_to_ptr.vmem [resolvable:$true] %s168_s11 }
   0xf   :  { %v190_v7 = vunpack.c.l.bf16 %v189_v5  ;;  %v191_v8 = vunpack.c.h.bf16 %v189_v5  ;;  %192 = vmatpush.msra.mxu3 %v113_v6  ;;  %82 = vmatpush.msra.mxu0 %v59_v3  ;;  %v57_v10 = vld [vmem:[%s349_s1] sm:$0xff]  ;;  %v58_v13 = vld [vmem:[%s349_s1 + $0x8] sm:$0xff]  ;;  %s170_s1 = sshll.u32 %s353_s5, 4  ;;  %s171_s1 = int_to_ptr.hbm [resolvable:$true] %s170_s1 }
  0x10   :  { %105 = vmatpush.msra.mxu1 %v61_v4  ;;  %134 = vmatpush.msra.mxu2 %v112_v9  ;;  %v110_v12 = vld [vmem:[#allocation5] sm:$0xff] }
  0x11   :  { %184 = vmatmul.msk.f32.vlgmr.msra.gmra.mxu0 %vm63_vm0, %v190_v7  ;;  %185 = vmatmul.msk.f32.vlgmr.msra.gmra.mxu1 %vm63_vm0, %v191_v8  ;;  %v203_v17 = vld [vmem:[%s352_s4] ss:$0 sm:$0xff] }
  0x12   :  { %193 = vmatpush.msra.mxu3 %v112_v9  ;;  %150 = vperm.xlu0 %202, %v57_v10  }
  0x13   :  { %135 = vmatpush.msra.mxu2 %v111_v11 }
  0x14   :  { %194 = vmatpush.msra.mxu3 %v111_v11 }
  0x15   :  { %136 = vmatpush.msra.mxu2 %v110_v12 }
  0x16   :  { %195 = vmatpush.msra.mxu3 %v110_v12 }
  0x1a   :  { %155 = vperm.xlu0 %202, %v58_v13  }
  0x84   :  { %v151_v16 = vpop.permute.xlu0 %150 }
  0x85   :  { %v158_v19 = vmul.f32 %v203_v17, %v151_v16 }
  0x8c   :  { %v156_v18 = vpop.permute.xlu0 %155 }
  0x8d   :  { %v159_v20 = vmul.f32 %v203_v17, %v156_v18 }
  0x8e   :  { %v84_v14 = vpop.f32.mrf.mxu0  ;;  %v107_v15 = vpop.f32.mrf.mxu1 }
  0x8f   :  { %186 = vmatmul.msk.f32.vlgmr.msra.gmra.mxu2 %vm114_vm1, %v84_v14  ;;  %187 = vmatmul.msk.f32.vlgmr.msra.gmra.mxu3 %vm114_vm1, %v107_v15 }
 0x112   :  { %v138_v21 = vpop.f32.mrf.mxu2  ;;  %v141_v22 = vpop.f32.mrf.mxu3 }
 0x113   :  { %v160_v23 = vadd.f32 %v158_v19, %v138_v21  ;;  %v161_v24 = vadd.f32 %v159_v20, %v141_v22 }
 0x115   :  { %162 = vst [vmem:[#allocation7] sm:$0xff] %v160_v23 }
 0x116   :  { %163 = vst [vmem:[#allocation7 + $0x8] sm:$0xff] %v161_v24 }
 0x117   :  { %176 = dma.vmem_to_hbm [thread:$0]  %s169_s11, 256, %s171_s1, [#allocation4], %s283_s26, %s283_s26, %s284_s27  }
 0x118   :  { %280 = dma.done.wait [#allocation4], 256  }
 0x119   :  { %281 = vsyncadd [#allocation4], 4294967040 }
 0x11a   :  { %181 = vsyncpa [#allocation3], 1 }
 0x11b   :  { %182 = vsyncpa [#allocation6], 1 }
 0x11c   :  { %183 = vsyncpa [#allocation4], 1 }

</bundles_post_ra>
